<compile_context>
chip_gen: v6e
topology: v6e:2x2x1
jax: 0.10.0
libtpu: 0.0.40
codegen_flags: <defaults>
</compile_context>

<pallas_src>
import jax
import jax.numpy as jnp
from jax.experimental import pallas as pl
from jax.experimental.pallas import tpu as pltpu


NEG_SLOPE = 0.01       # nn.LeakyReLU default
H1, H2, N_OUT = 128, 256, 2
W3_PAD = 128           # lane-dense padded width for the 2-wide fc3 MXU output
TM_TARGET = 1024       # large batch tile; per-step overhead amortizes, VMEM is ample


def _leaky_relu(v):
    # mul + max (2 VPU ops) instead of cmp + mul + select (3).
    return jnp.maximum(v, NEG_SLOPE * v)


def _round_up(x, m):
    return ((x + m - 1) // m) * m


def make_top_kernel(n_parts):
    """Kernel for `n_parts` concatenated input parts (the concat is fused away)."""

    def kernel(*refs):
        x_refs = refs[:n_parts]
        w1_refs = refs[n_parts:2 * n_parts]
        b1_ref, w2_ref, b2_ref, w3_ref, b3_ref, o_ref = refs[2 * n_parts:]

        # fc1: torch.cat(x, dim=1) @ W1.T  ==  sum_i x_i @ W1_i   (no HBM concat)
        acc = None
        for xr, wr in zip(x_refs, w1_refs):
            d = jnp.dot(xr[...].astype(jnp.bfloat16), wr[...],
                        preferred_element_type=jnp.float32)
            acc = d if acc is None else acc + d
        h1 = _leaky_relu(acc + b1_ref[...])                                # (TM, 128) f32

        h2 = _leaky_relu(
            jnp.dot(h1.astype(jnp.bfloat16), w2_ref[...],
                    preferred_element_type=jnp.float32) + b2_ref[...])     # (TM, 256) f32

        h3 = _leaky_relu(
            jnp.dot(h2.astype(jnp.bfloat16), w3_ref[...],
                    preferred_element_type=jnp.float32) + b3_ref[...])     # (TM, 128) f32

        # Dropout(p=0.1) in eval mode is identity.
        # Narrow store: only the 2 real output columns hit HBM; padded fc3 columns
        # (exactly zero by construction) stay in VMEM.
        o_ref[...] = h3[:, :N_OUT].astype(o_ref.dtype)

    return kernel


def init_params(key, in_size):
    """PyTorch nn.Linear-style params: W (out, in), b (out,)."""
    dims = [(H1, in_size), (H2, H1), (N_OUT, H2)]
    params = []
    for i, (out_d, in_d) in enumerate(dims):
        kw, kb = jax.random.split(jax.random.fold_in(key, i))
        bound = 1.0 / jnp.sqrt(in_d)
        w = jax.random.uniform(kw, (out_d, in_d), jnp.float32, -bound, bound)
        b = jax.random.uniform(kb, (out_d,), jnp.float32, -bound, bound)
        params += [w, b]
    return tuple(params)


def prepare_params(params, part_dims):
    """One-time prep: transpose to (in, out), cast weights to bf16, split W1 per input
    part, zero-pad fc3 to a lane-dense 128-wide MXU output. Biases stay f32 (1, out)."""
    w1, b1, w2, b2, w3, b3 = params

    w1_t = jnp.asarray(w1.T, jnp.bfloat16)                  # (in_size, 128)
    splits, off = [], 0
    for d in part_dims[:-1]:
        off += int(d)
        splits.append(off)
    w1_parts = tuple(jnp.split(w1_t, splits, axis=0))       # [(d_i, 128), ...]

    w2_t = jnp.asarray(w2.T, jnp.bfloat16)                  # (128, 256)
    w3_t = jnp.asarray(w3.T, jnp.bfloat16)                  # (256, 2)
    w3_p = jnp.zeros((H2, W3_PAD), jnp.bfloat16).at[:, :N_OUT].set(w3_t)
    b3_p = jnp.zeros((1, W3_PAD), jnp.float32).at[0, :N_OUT].set(b3)

    return dict(
        w1_parts=w1_parts,
        b1=b1[None, :].astype(jnp.float32),
        w2=w2_t,
        b2=b2[None, :].astype(jnp.float32),
        w3=w3_p,
        b3=b3_p,
        part_dims=tuple(int(d) for d in part_dims),
    )


def _choose_tm(B):
    if B <= 8:
        return _round_up(max(B, 1), 8)
    # Big tiles amortize the ~0.35us per-step cost; cap at ceil(B/2) (sublane-aligned)
    # so the "parallel" batch axis has >= 2 blocks and both v7x TensorCores get work.
    half = _round_up((B + 1) // 2, 8)
    return min(TM_TARGET, half)


def top_model_forward(x_list, prep):
    """x_list: list of (B, d_i) arrays (same as torch.cat(x, dim=1) input).
    Inputs keep their dtype (bf16 parts accepted as-is); kernel casts for the MXU."""
    n_parts = len(x_list)
    assert n_parts == len(prep["w1_parts"])
    B = x_list[0].shape[0]

    TM = _choose_tm(B)
    grid = (pl.cdiv(B, TM),)     # ragged last block is masked by Pallas; no jnp.pad

    def resident(arr):           # weights/biases stay in VMEM across grid steps
        return pl.BlockSpec(arr.shape, lambda i: (0, 0))

    in_specs = (
        [pl.BlockSpec((TM, int(x.shape[1])), lambda i: (i, 0)) for x in x_list]
        + [resident(w) for w in prep["w1_parts"]]
        + [resident(prep["b1"]),
           resident(prep["w2"]), resident(prep["b2"]),
           resident(prep["w3"]), resident(prep["b3"])]
    )

    return pl.pallas_call(
        make_top_kernel(n_parts),
        out_shape=jax.ShapeDtypeStruct((B, N_OUT), jnp.float32),
        grid=grid,
        in_specs=in_specs,
        out_specs=pl.BlockSpec((TM, N_OUT), lambda i: (i, 0)),
        compiler_params=pltpu.CompilerParams(dimension_semantics=("parallel",)),
    )(*x_list, *prep["w1_parts"], prep["b1"], prep["w2"], prep["b2"],
      prep["w3"], prep["b3"])


def ref_forward_bf16(x_list, params):
    """Pure-JAX reference emulating the kernel's bf16-operand / f32-accum matmuls."""
    x = jnp.concatenate([jnp.asarray(t, jnp.float32) for t in x_list], axis=1)
    w1, b1, w2, b2, w3, b3 = params

    def lin(h, w, b):
        return jnp.dot(h.astype(jnp.bfloat16), w.T.astype(jnp.bfloat16),
                       preferred_element_type=jnp.float32) + b

    lrelu = lambda v: jnp.where(v >= 0, v, NEG_SLOPE * v)
    h = lrelu(lin(x, w1, b1))
    h = lrelu(lin(h, w2, b2))
    h = lrelu(lin(h, w3, b3))
    return h


if __name__ == "__main__":
    key = jax.random.PRNGKey(0)
    k1, k2, kp = jax.random.split(key, 3)

    # Two "local models", each producing local_out_dim = 16 features -> in_size = 32.
    B = 8
    x_list = [
        jax.random.normal(k1, (B, 16), jnp.float32),
        jax.random.normal(k2, (B, 16), jnp.float32),
    ]
    part_dims = [t.shape[1] for t in x_list]
    in_size = sum(part_dims)

    params = init_params(kp, in_size)
    prep = prepare_params(params, part_dims)     # one-time (pre-transposed / bf16 / padded)

    out = jax.block_until_ready(top_model_forward(x_list, prep))
    assert out.shape == (B, N_OUT)

    # Check against a reference that uses the same bf16-operand / f32-accum matmuls.
    ref = ref_forward_bf16(x_list, params)
    assert jnp.allclose(out, ref, atol=1e-4, rtol=1e-4), (
        f"max abs diff {jnp.max(jnp.abs(out - ref))}")

    # Sanity check against full-f32 math (loose tolerance for bf16 operands).
    w1, b1, w2, b2, w3, b3 = params
    lrelu = lambda v: jnp.where(v >= 0, v, NEG_SLOPE * v)
    xc = jnp.concatenate(x_list, axis=1)
    ref_f32 = lrelu(lrelu(lrelu(xc @ w1.T + b1) @ w2.T + b2) @ w3.T + b3)
    assert jnp.allclose(out, ref_f32, atol=5e-2, rtol=5e-2)

    print("KERNEL_OK")
</pallas_src>

<mosaic_0001>
module attributes {stable_mosaic.version = 11 : i64} {
  func.func @kernel(%arg0: i32, %arg1: memref<8x16xf32, #tpu.memory_space<vmem>>, %arg2: memref<8x16xf32, #tpu.memory_space<vmem>>, %arg3: memref<16x128xbf16, #tpu.memory_space<vmem>>, %arg4: memref<16x128xbf16, #tpu.memory_space<vmem>>, %arg5: memref<1x128xf32, #tpu.memory_space<vmem>>, %arg6: memref<128x256xbf16, #tpu.memory_space<vmem>>, %arg7: memref<1x256xf32, #tpu.memory_space<vmem>>, %arg8: memref<256x128xbf16, #tpu.memory_space<vmem>>, %arg9: memref<1x128xf32, #tpu.memory_space<vmem>>, %arg10: memref<8x2xf32, #tpu.memory_space<vmem>>) attributes {dimension_semantics = [#tpu.dimension_semantics<parallel>], iteration_bounds = array<i64: 1>, scalar_prefetch = 0 : i64, scratch_operands = 0 : i64, tpu.core_type = #tpu.core_type<tc>, window_params = [{transform_indices = @transform_0, window_bounds = array<i64: 8, 16>}, {transform_indices = @transform_1, window_bounds = array<i64: 8, 16>}, {pipeline_mode = #tpu.pipeline_mode<synchronous>, transform_indices = @transform_2, window_bounds = array<i64: 16, 128>}, {pipeline_mode = #tpu.pipeline_mode<synchronous>, transform_indices = @transform_3, window_bounds = array<i64: 16, 128>}, {pipeline_mode = #tpu.pipeline_mode<synchronous>, transform_indices = @transform_4, window_bounds = array<i64: 1, 128>}, {pipeline_mode = #tpu.pipeline_mode<synchronous>, transform_indices = @transform_5, window_bounds = array<i64: 128, 256>}, {pipeline_mode = #tpu.pipeline_mode<synchronous>, transform_indices = @transform_6, window_bounds = array<i64: 1, 256>}, {pipeline_mode = #tpu.pipeline_mode<synchronous>, transform_indices = @transform_7, window_bounds = array<i64: 256, 128>}, {pipeline_mode = #tpu.pipeline_mode<synchronous>, transform_indices = @transform_8, window_bounds = array<i64: 1, 128>}, {transform_indices = @transform_9, window_bounds = array<i64: 8, 2>}]} {
    %c0 = arith.constant 0 : index
    %c0_0 = arith.constant 0 : index
    %0 = vector.load %arg1[%c0, %c0_0] : memref<8x16xf32, #tpu.memory_space<vmem>>, vector<8x16xf32>
    %1 = arith.truncf %0 : vector<8x16xf32> to vector<8x16xbf16>
    %c0_1 = arith.constant 0 : index
    %c0_2 = arith.constant 0 : index
    %2 = vector.load %arg3[%c0_1, %c0_2] : memref<16x128xbf16, #tpu.memory_space<vmem>>, vector<16x128xbf16>
    %cst = arith.constant dense<0.000000e+00> : vector<8x128xf32>
    %3 = tpu.matmul %1, %2, %cst {dimension_numbers = #tpu.dot_dimension_numbers<[1], [0], [0], [1], [0, 0, 1, 1], [], []>} : vector<8x16xbf16>, vector<16x128xbf16>, vector<8x128xf32> -> vector<8x128xf32>
    %c0_3 = arith.constant 0 : index
    %c0_4 = arith.constant 0 : index
    %4 = vector.load %arg2[%c0_3, %c0_4] : memref<8x16xf32, #tpu.memory_space<vmem>>, vector<8x16xf32>
    %5 = arith.truncf %4 : vector<8x16xf32> to vector<8x16xbf16>
    %c0_5 = arith.constant 0 : index
    %c0_6 = arith.constant 0 : index
    %6 = vector.load %arg4[%c0_5, %c0_6] : memref<16x128xbf16, #tpu.memory_space<vmem>>, vector<16x128xbf16>
    %cst_7 = arith.constant dense<0.000000e+00> : vector<8x128xf32>
    %7 = tpu.matmul %5, %6, %cst_7 {dimension_numbers = #tpu.dot_dimension_numbers<[1], [0], [0], [1], [0, 0, 1, 1], [], []>} : vector<8x16xbf16>, vector<16x128xbf16>, vector<8x128xf32> -> vector<8x128xf32>
    %8 = arith.addf %3, %7 : vector<8x128xf32>
    %c0_8 = arith.constant 0 : index
    %c0_9 = arith.constant 0 : index
    %9 = vector.load %arg5[%c0_8, %c0_9] : memref<1x128xf32, #tpu.memory_space<vmem>>, vector<1x128xf32>
    %10 = vector.broadcast %9 : vector<1x128xf32> to vector<8x128xf32>
    %11 = arith.addf %8, %10 : vector<8x128xf32>
    %cst_10 = arith.constant 0.00999999977 : f32
    %12 = vector.broadcast %cst_10 : f32 to vector<8x128xf32>
    %13 = arith.mulf %12, %11 : vector<8x128xf32>
    %14 = arith.maximumf %11, %13 : vector<8x128xf32>
    %15 = arith.truncf %14 : vector<8x128xf32> to vector<8x128xbf16>
    %c0_11 = arith.constant 0 : index
    %c0_12 = arith.constant 0 : index
    %16 = vector.load %arg6[%c0_11, %c0_12] : memref<128x256xbf16, #tpu.memory_space<vmem>>, vector<128x256xbf16>
    %cst_13 = arith.constant dense<0.000000e+00> : vector<8x256xf32>
    %17 = tpu.matmul %15, %16, %cst_13 {dimension_numbers = #tpu.dot_dimension_numbers<[1], [0], [0], [1], [0, 0, 1, 1], [], []>} : vector<8x128xbf16>, vector<128x256xbf16>, vector<8x256xf32> -> vector<8x256xf32>
    %c0_14 = arith.constant 0 : index
    %c0_15 = arith.constant 0 : index
    %18 = vector.load %arg7[%c0_14, %c0_15] : memref<1x256xf32, #tpu.memory_space<vmem>>, vector<1x256xf32>
    %19 = vector.broadcast %18 : vector<1x256xf32> to vector<8x256xf32>
    %20 = arith.addf %17, %19 : vector<8x256xf32>
    %cst_16 = arith.constant 0.00999999977 : f32
    %21 = vector.broadcast %cst_16 : f32 to vector<8x256xf32>
    %22 = arith.mulf %21, %20 : vector<8x256xf32>
    %23 = arith.maximumf %20, %22 : vector<8x256xf32>
    %24 = arith.truncf %23 : vector<8x256xf32> to vector<8x256xbf16>
    %c0_17 = arith.constant 0 : index
    %c0_18 = arith.constant 0 : index
    %25 = vector.load %arg8[%c0_17, %c0_18] : memref<256x128xbf16, #tpu.memory_space<vmem>>, vector<256x128xbf16>
    %cst_19 = arith.constant dense<0.000000e+00> : vector<8x128xf32>
    %26 = tpu.matmul %24, %25, %cst_19 {dimension_numbers = #tpu.dot_dimension_numbers<[1], [0], [0], [1], [0, 0, 1, 1], [], []>} : vector<8x256xbf16>, vector<256x128xbf16>, vector<8x128xf32> -> vector<8x128xf32>
    %c0_20 = arith.constant 0 : index
    %c0_21 = arith.constant 0 : index
    %27 = vector.load %arg9[%c0_20, %c0_21] : memref<1x128xf32, #tpu.memory_space<vmem>>, vector<1x128xf32>
    %28 = vector.broadcast %27 : vector<1x128xf32> to vector<8x128xf32>
    %29 = arith.addf %26, %28 : vector<8x128xf32>
    %cst_22 = arith.constant 0.00999999977 : f32
    %30 = vector.broadcast %cst_22 : f32 to vector<8x128xf32>
    %31 = arith.mulf %30, %29 : vector<8x128xf32>
    %32 = arith.maximumf %29, %31 : vector<8x128xf32>
    %33 = vector.extract_strided_slice %32 {offsets = [0, 0], sizes = [8, 2], strides = [1, 1]} : vector<8x128xf32> to vector<8x2xf32>
    %c0_23 = arith.constant 0 : index
    %c0_24 = arith.constant 0 : index
    %34 = vector.load %arg10[%c0_23, %c0_24] : memref<8x2xf32, #tpu.memory_space<vmem>>, vector<8x2xf32>
    tpu.vector_store %arg10[%c0_23, %c0_24], %33 {strides = array<i32>} : memref<8x2xf32, #tpu.memory_space<vmem>>, vector<8x2xf32>,
    return
  }
  func.func @transform_0(%arg0: i32) -> (i32, i32) {
    %c0_i32 = arith.constant 0 : i32
    %c0_i32_0 = arith.constant 0 : i32
    return %arg0, %c0_i32 : i32, i32
  }
  func.func @transform_1(%arg0: i32) -> (i32, i32) {
    %c0_i32 = arith.constant 0 : i32
    %c0_i32_0 = arith.constant 0 : i32
    return %arg0, %c0_i32 : i32, i32
  }
  func.func @transform_2(%arg0: i32) -> (i32, i32) {
    %c0_i32 = arith.constant 0 : i32
    %c0_i32_0 = arith.constant 0 : i32
    %c0_i32_1 = arith.constant 0 : i32
    return %c0_i32, %c0_i32_0 : i32, i32
  }
  func.func @transform_3(%arg0: i32) -> (i32, i32) {
    %c0_i32 = arith.constant 0 : i32
    %c0_i32_0 = arith.constant 0 : i32
    %c0_i32_1 = arith.constant 0 : i32
    return %c0_i32, %c0_i32_0 : i32, i32
  }
  func.func @transform_4(%arg0: i32) -> (i32, i32) {
    %c0_i32 = arith.constant 0 : i32
    %c0_i32_0 = arith.constant 0 : i32
    %c0_i32_1 = arith.constant 0 : i32
    return %c0_i32, %c0_i32_0 : i32, i32
  }
  func.func @transform_5(%arg0: i32) -> (i32, i32) {
    %c0_i32 = arith.constant 0 : i32
    %c0_i32_0 = arith.constant 0 : i32
    %c0_i32_1 = arith.constant 0 : i32
    return %c0_i32, %c0_i32_0 : i32, i32
  }
  func.func @transform_6(%arg0: i32) -> (i32, i32) {
    %c0_i32 = arith.constant 0 : i32
    %c0_i32_0 = arith.constant 0 : i32
    %c0_i32_1 = arith.constant 0 : i32
    return %c0_i32, %c0_i32_0 : i32, i32
  }
  func.func @transform_7(%arg0: i32) -> (i32, i32) {
    %c0_i32 = arith.constant 0 : i32
    %c0_i32_0 = arith.constant 0 : i32
    %c0_i32_1 = arith.constant 0 : i32
    return %c0_i32, %c0_i32_0 : i32, i32
  }
  func.func @transform_8(%arg0: i32) -> (i32, i32) {
    %c0_i32 = arith.constant 0 : i32
    %c0_i32_0 = arith.constant 0 : i32
    %c0_i32_1 = arith.constant 0 : i32
    return %c0_i32, %c0_i32_0 : i32, i32
  }
  func.func @transform_9(%arg0: i32) -> (i32, i32) {
    %c0_i32 = arith.constant 0 : i32
    %c0_i32_0 = arith.constant 0 : i32
    return %arg0, %c0_i32 : i32, i32
  }
}

</mosaic_0001>

<bundles_post_ra>
// kernel: tpu_custom_call.1
= control target key start
LH: loop header
LB: loop body
LE: loop exit
PB: predicated region body
PF: predicated region fallthrough
CT: control target
= control target key end

     0   :  { %14 = vsyncpa [#allocation3], 0  ;;  %s932_s0 = inlined_call_operand.hbm [shape: f32[8,16], index: 0, kind: input, shape index: {}]   ;;  %s933_s1 = inlined_call_operand.hbm [shape: f32[8,16], index: 1, kind: input, shape index: {}]   ;;  %s934_s2 = inlined_call_operand.hbm [shape: bf16[16,128], index: 2, kind: input, shape index: {}]   ;;  %s935_s3 = inlined_call_operand.hbm [shape: bf16[16,128], index: 3, kind: input, shape index: {}]   ;;  %s936_s4 = inlined_call_operand.vmem [shape: f32[1,128], index: 4, kind: input, shape index: {}]   ;;  %s937_s5 = inlined_call_operand.hbm [shape: bf16[128,256], index: 5, kind: input, shape index: {}]   ;;  %s938_s6 = inlined_call_operand.vmem [shape: f32[1,256], index: 6, kind: input, shape index: {}]   ;;  %s939_s7 = inlined_call_operand.hbm [shape: bf16[256,128], index: 7, kind: input, shape index: {}]   ;;  %s940_s8 = inlined_call_operand.vmem [shape: f32[1,128], index: 8, kind: input, shape index: {}]   ;;  %s941_s9 = inlined_call_operand.vmem [shape: f32[8,2], index: 9, kind: output, shape index: {}]  }
   0x1   :  { %15 = vsyncpa [#allocation5], 0 }
   0x2   :  { %16 = vsyncpa [#allocation8], 0 }
   0x3   :  { %17 = vsyncpa [#allocation11], 0  ;;  %s830_s30 = smov [#allocation4]  }
   0x4   :  { %s34_s10 = sshll.u32 %s830_s30, 4  ;;  %s35_s10 = int_to_ptr.vmem [resolvable:$true] %s34_s10 }
   0x5   :  { %s710_s11 = scalar_lea.vmem %s35_s10, 128  ;;  %p715_p1 = scmp.lt.s32.totalorder %s35_s10, %s35_s10 }
   0x6   :  { %p711_p0 = scmp.ne.s32.totalorder %s35_s10, %s710_s11  ;;  %p716_p2 = scmp.lt.s32.totalorder %s710_s11, %s710_s11 }
   0x8   :  { %p717_p3 = por %p716_p2, %p715_p1 }
   0xa   :  { %p718_p4 = pnand %p717_p3, %p711_p0 }
   0xc   :  { %721 = shalt.err (!%p718_p4)
}
   0xd   :  { %37 = dma.hbm_to_vmem [thread:$0]  %s933_s1, 128, %s35_s10, [#allocation5]  }
   0xe   :  { %s831_s14 = smov [#allocation7]   ;;  %s832_s16 = smov [#allocation2]  }
   0xf   :  { %s55_s15 = sshll.u32 %s831_s14, 4  ;;  %s24_s17 = sshll.u32 %s832_s16, 4  ;;  %s56_s15 = int_to_ptr.vmem [resolvable:$true] %s55_s15  ;;  %s25_s17 = int_to_ptr.vmem [resolvable:$true] %s24_s17 }
  0x10   :  { %s730_s18 = scalar_lea.vmem %s56_s15, 128  ;;  %p735_p6 = scmp.lt.s32.totalorder %s56_s15, %s56_s15 }
  0x11   :  { %p731_p5 = scmp.ne.s32.totalorder %s56_s15, %s730_s18  ;;  %p736_p7 = scmp.lt.s32.totalorder %s730_s18, %s730_s18 }
  0x13   :  { %p737_p8 = por %p736_p7, %p735_p6 }
  0x15   :  { %p738_p9 = pnand %p737_p8, %p731_p5 }
  0x17   :  { %741 = shalt.err (!%p738_p9)
}
  0x18   :  { %s833_s19 = smov 64   ;;  %s834_s20 = smov 4  }
  0x19   :  { %61 = dma.hbm_to_vmem [thread:$0]  %s935_s3, 128, %s56_s15, [#allocation8], %s833_s19, %s833_s19, %s834_s20  }
  0x1a   :  { %s750_s1 = scalar_lea.vmem %s25_s17, 128  ;;  %p755_p11 = scmp.lt.s32.totalorder %s25_s17, %s25_s17 }
  0x1b   :  { %p751_p10 = scmp.ne.s32.totalorder %s25_s17, %s750_s1  ;;  %p756_p12 = scmp.lt.s32.totalorder %s750_s1, %s750_s1 }
  0x1d   :  { %p757_p13 = por %p756_p12, %p755_p11 }
  0x1f   :  { %p758_p0 = pnand %p757_p13, %p751_p10 }
  0x21   :  { %761 = shalt.err (!%p758_p0)
}
  0x22   :  { %27 = dma.hbm_to_vmem [thread:$0]  %s932_s0, 128, %s25_s17, [#allocation3]  }
  0x23   :  { %s835_s25 = smov [#allocation6]   ;;  %s836_s27 = smov [#allocation9]  }
  0x24   :  { %s43_s26 = sshll.u32 %s835_s25, 4  ;;  %s69_s28 = sshll.u32 %s836_s27, 4  ;;  %s44_s26 = int_to_ptr.vmem [resolvable:$true] %s43_s26  ;;  %s70_s28 = int_to_ptr.vmem [resolvable:$true] %s69_s28 }
  0x25   :  { %s770_s29 = scalar_lea.vmem %s44_s26, 128  ;;  %p775_p2 = scmp.lt.s32.totalorder %s44_s26, %s44_s26 }
  0x26   :  { %p771_p1 = scmp.ne.s32.totalorder %s44_s26, %s770_s29  ;;  %p776_p3 = scmp.lt.s32.totalorder %s770_s29, %s770_s29 }
  0x28   :  { %p777_p4 = por %p776_p3, %p775_p2 }
  0x2a   :  { %p778_p5 = pnand %p777_p4, %p771_p1 }
  0x2c   :  { %781 = shalt.err (!%p778_p5)
}
  0x2d   :  { %49 = dma.hbm_to_vmem [thread:$0]  %s934_s2, 128, %s44_s26, [#allocation5], %s833_s19, %s833_s19, %s834_s20  }
  0x2e   :  { %s790_s0 = scalar_lea.vmem %s70_s28, 2048  ;;  %p795_p7 = scmp.lt.s32.totalorder %s70_s28, %s70_s28 }
  0x2f   :  { %p791_p6 = scmp.ne.s32.totalorder %s70_s28, %s790_s0  ;;  %p796_p8 = scmp.lt.s32.totalorder %s790_s0, %s790_s0 }
  0x31   :  { %p797_p9 = por %p796_p8, %p795_p7 }
  0x33   :  { %p798_p10 = pnand %p797_p9, %p791_p6 }
  0x35   :  { %801 = shalt.err (!%p798_p10)
}
  0x36   :  { %s837_s10 = smov 128   ;;  %s838_s11 = smov 8  }
  0x37   :  { %75 = dma.hbm_to_vmem [thread:$0]  %s937_s5, 2048, %s70_s28, [#allocation8], %s837_s10, %s837_s10, %s838_s11  }
  0x38   :  { %s839_s14 = smov [#allocation10]  }
  0x39   :  { %s83_s15 = sshll.u32 %s839_s14, 4  ;;  %s84_s15 = int_to_ptr.vmem [resolvable:$true] %s83_s15 }
  0x3a   :  { %s810_s16 = scalar_lea.vmem %s84_s15, 2048  ;;  %p815_p12 = scmp.lt.s32.totalorder %s84_s15, %s84_s15 }
  0x3b   :  { %p811_p11 = scmp.ne.s32.totalorder %s84_s15, %s810_s16  ;;  %p816_p13 = scmp.lt.s32.totalorder %s810_s16, %s810_s16 }
  0x3d   :  { %p817_p0 = por %p816_p13, %p815_p12 }
  0x3f   :  { %p818_p1 = pnand %p817_p0, %p811_p11 }
  0x41   :  { %821 = shalt.err (!%p818_p1)
}
  0x42   :  { %89 = dma.hbm_to_vmem [thread:$0]  %s939_s7, 2048, %s84_s15, [#allocation11], %s833_s19, %s833_s19, %s834_s20  }
  0x43   :  { %822 = dma.done.wait [#allocation3], 128  }
  0x44   :  { %823 = vsyncadd [#allocation3], 4294967168 }
  0x45   :  { %824 = dma.done.wait [#allocation5], 256  }
  0x46   :  { %825 = vsyncadd [#allocation5], 4294967040 }
  0x47   :  { %826 = dma.done.wait [#allocation8], 2176  }
  0x48   :  { %827 = vsyncadd [#allocation8], 4294965120 }
  0x49   :  { %828 = dma.done.wait [#allocation11], 2048  }
  0x4a   :  { %829 = vsyncadd [#allocation11], 4294965248  ;;  %v840_v0 = vmov 0.0   ;;  %vm841_vm0 = vmmov 0   ;;  %v660_v1 = vld [vmem:[#allocation7] sm:$0xff]   ;;  %v661_v2 = vld [vmem:[#allocation6] sm:$0xff]   ;;  %v247_v54 = vlaneseq }
  0x4b   :  { %635 = vmatprep.subr.bf16.mxu0 %v840_v0  ;;  %641 = vmatprep.subr.bf16.mxu1 %v840_v0  ;;  %v115_v3 = vld [vmem:[#allocation4] sm:$0xff]  ;;  %vm125_vm1 = vcmask 130048   ;;  %v111_v4 = vld [vmem:[#allocation2] sm:$0xff]  ;;  %v662_v7 = vld [vmem:[#allocation9 + $0x70] ss:$8 sps:$4 sm:$0xff]   ;;  %v842_v23 = vmov 0  }
  0x4c   :  { %637 = vmatprep.mubr.msk.bf16.mxu0 %vm841_vm0, %v840_v0  ;;  %643 = vmatprep.mubr.msk.bf16.mxu1 %vm841_vm0, %v840_v0  ;;  %v116_v5 = vpack.c.bf16 %v115_v3, %v115_v3  ;;  %v112_v6 = vpack.c.bf16 %v111_v4, %v111_v4  ;;  %v664_v8 = vld [vmem:[#allocation9 + $0x74] ss:$8 sps:$4 sm:$0xff]   ;;  %v667_v9 = vld [vmem:[#allocation9 + $0x64] ss:$8 sps:$4 sm:$0xff]   ;;  %v665_v10 = vld [vmem:[#allocation9 + $0x60] ss:$8 sps:$4 sm:$0xff]  }
  0x4d   :  { %636 = vmatpush3.bf16.msra.mxu0 %v660_v1  ;;  %642 = vmatpush3.bf16.msra.mxu1 %v661_v2  ;;  %v670_v11 = vld [vmem:[#allocation9 + $0x54] ss:$8 sps:$4 sm:$0xff]   ;;  %v668_v12 = vld [vmem:[#allocation9 + $0x50] ss:$8 sps:$4 sm:$0xff]   ;;  %v673_v13 = vld [vmem:[#allocation9 + $0x44] ss:$8 sps:$4 sm:$0xff]  }
  0x4e   :  { %337 = vmatprep.subr.bf16.mxu0 %v664_v8  ;;  %v671_v14 = vld [vmem:[#allocation9 + $0x40] ss:$8 sps:$4 sm:$0xff]   ;;  %v676_v15 = vld [vmem:[#allocation9 + $0x34] ss:$8 sps:$4 sm:$0xff]   ;;  %v674_v16 = vld [vmem:[#allocation9 + $0x30] ss:$8 sps:$4 sm:$0xff]  }
  0x4f   :  { %v679_v17 = vld [vmem:[#allocation9 + $0x24] ss:$8 sps:$4 sm:$0xff]   ;;  %v677_v18 = vld [vmem:[#allocation9 + $0x20] ss:$8 sps:$4 sm:$0xff]   ;;  %v682_v19 = vld [vmem:[#allocation9 + $0x14] ss:$8 sps:$4 sm:$0xff]  }
  0x50   :  { %638 = vmatmul.mubr.msk.bf16.vlgmr.msra.gmra.mxu0 %vm125_vm1, %v116_v5  ;;  %644 = vmatmul.mubr.msk.bf16.vlgmr.msra.gmra.mxu1 %vm125_vm1, %v112_v6  ;;  %v680_v20 = vld [vmem:[#allocation9 + $0x10] ss:$8 sps:$4 sm:$0xff]   ;;  %v685_v21 = vld [vmem:[#allocation9 + $0x4] ss:$8 sps:$4 sm:$0xff]   ;;  %v683_v22 = vld [vmem:[#allocation9] ss:$8 sps:$4 sm:$0xff]  }
  0x51   :  { %338 = vmatpush1.bf16.msra.mxu0 %v662_v7  ;;  %369 = vmatprep.mubr.bf16.mxu0 %v842_v23  ;;  %v686_v24 = vld [vmem:[#allocation10 + $0x78] sm:$0xff]   ;;  %v688_v26 = vld [vmem:[#allocation10 + $0x70] sm:$0xff]   ;;  %v690_v28 = vld [vmem:[#allocation10 + $0x68] sm:$0xff]   ;;  %v248_v55 = vshrl.u32 %v247_v54, 7  ;;  %vm561_vm2 = vcmask 15360  }
  0x52   :  { %339 = vmatprep.subr.bf16.mxu0 %v667_v9  ;;  %v687_v25 = vld [vmem:[#allocation10 + $0x38] sm:$0xff]   ;;  %613 = vmatprep.subr.bf16.mxu1 %v686_v24  ;;  %v689_v27 = vld [vmem:[#allocation10 + $0x30] sm:$0xff]   ;;  %v691_v29 = vld [vmem:[#allocation10 + $0x28] sm:$0xff]  }
  0x53   :  { %614 = vmatpush3.bf16.msra.mxu1 %v687_v25  ;;  %v692_v30 = vld [vmem:[#allocation10 + $0x60] sm:$0xff]   ;;  %v694_v32 = vld [vmem:[#allocation10 + $0x58] sm:$0xff]   ;;  %v696_v48 = vld [vmem:[#allocation10 + $0x50] sm:$0xff]   ;;  %v249_v56 = vsub.s32 0, %v248_v55  ;;  %v253_v58 = vsub.s32 1, %v248_v55 }
  0x54   :  { %615 = vmatprep.subr.bf16.mxu1 %v688_v26  ;;  %v693_v31 = vld [vmem:[#allocation10 + $0x20] sm:$0xff]   ;;  %v695_v33 = vld [vmem:[#allocation10 + $0x18] sm:$0xff]   ;;  %v697_v49 = vld [vmem:[#allocation10 + $0x10] sm:$0xff]  }
  0x55   :  { %340 = vmatpush1.bf16.msra.mxu0 %v665_v10  ;;  %v575_v36 = vld [vmem:[%s936_s4] ss:$0 sm:$0xff]  ;;  %v698_v50 = vld [vmem:[#allocation10 + $0x48] sm:$0xff]  }
  0x56   :  { %341 = vmatprep.subr.bf16.mxu0 %v670_v11  ;;  %v699_v51 = vld [vmem:[#allocation10 + $0x8] sm:$0xff]   ;;  %v700_v52 = vld [vmem:[#allocation10 + $0x40] sm:$0xff]  }
  0x57   :  { %616 = vmatpush3.bf16.msra.mxu1 %v689_v27  ;;  %v701_v53 = vld [vmem:[#allocation10] sm:$0xff]  }
  0x58   :  { %617 = vmatprep.subr.bf16.mxu1 %v690_v28  ;;  %v245_v57 = vld [vmem:[%s938_s6] sm:$0x3] }
  0x59   :  { %342 = vmatpush1.bf16.msra.mxu0 %v668_v12  ;;  %v250_v59 = vrot.slane %v245_v57, %v249_v56  ;;  %v254_v60 = vrot.slane %v245_v57, %v253_v58  ;;  %v592_v10 = vld [vmem:[%s940_s8] ss:$0 sm:$0xff] }
  0x5a   :  { %343 = vmatprep.subr.bf16.mxu0 %v673_v13 }
  0x5b   :  { %618 = vmatpush3.bf16.msra.mxu1 %v691_v29 }
  0x5c   :  { %619 = vmatprep.subr.bf16.mxu1 %v692_v30 }
  0x5d   :  { %344 = vmatpush1.bf16.msra.mxu0 %v671_v14 }
  0x5e   :  { %345 = vmatprep.subr.bf16.mxu0 %v676_v15 }
  0x5f   :  { %620 = vmatpush3.bf16.msra.mxu1 %v693_v31 }
  0x60   :  { %621 = vmatprep.subr.bf16.mxu1 %v694_v32 }
  0x61   :  { %346 = vmatpush1.bf16.msra.mxu0 %v674_v16 }
  0x62   :  { %347 = vmatprep.subr.bf16.mxu0 %v679_v17 }
  0x63   :  { %622 = vmatpush3.bf16.msra.mxu1 %v695_v33 }
  0x64   :  { %623 = vmatprep.subr.bf16.mxu1 %v696_v48 }
  0x65   :  { %348 = vmatpush1.bf16.msra.mxu0 %v677_v18 }
  0x66   :  { %349 = vmatprep.subr.bf16.mxu0 %v682_v19 }
  0x67   :  { %624 = vmatpush3.bf16.msra.mxu1 %v697_v49 }
  0x68   :  { %625 = vmatprep.subr.bf16.mxu1 %v698_v50 }
  0x69   :  { %350 = vmatpush1.bf16.msra.mxu0 %v680_v20 }
  0x6a   :  { %351 = vmatprep.subr.bf16.mxu0 %v685_v21 }
  0x6b   :  { %626 = vmatpush3.bf16.msra.mxu1 %v699_v51 }
  0x6c   :  { %627 = vmatprep.subr.bf16.mxu1 %v700_v52 }
  0x6d   :  { %352 = vmatpush1.bf16.msra.mxu0 %v683_v22 }
  0x6f   :  { %628 = vmatpush3.bf16.msra.mxu1 %v701_v53 }
 0x110   :  { %v163_v34 = vpop.f32.mrf.mxu0  ;;  %v212_v35 = vpop.f32.mrf.mxu1 }
 0x111   :  { %v213_v37 = vadd.f32 %v212_v35, %v163_v34 }
 0x112   :  { %v639_v38 = vpop.f32.mrf.mxu0  ;;  %v645_v39 = vpop.f32.mrf.mxu1 }
 0x113   :  { %v225_v40 = vadd.f32 %v575_v36, %v213_v37 }
 0x114   :  { %v166_v41 = vpop.f32.mrf.mxu0  ;;  %v215_v42 = vpop.f32.mrf.mxu1 }
 0x115   :  { %v226_v43 = vmul.f32 0.01, %v225_v40 }
 0x116   :  { %v640_v44 = vpop.f32.mrf.mxu0  ;;  %v646_v45 = vpop.f32.mrf.mxu1 }
 0x117   :  { %v227_v46 = vmax.f32 %v225_v40, %v226_v43 }
 0x119   :  { %v228_v47 = vpack.c.bf16 %v227_v46, %v227_v46 }
 0x11b   :  { %370 = vmatmul.mubr.bf16.vlgmr.msra.gmra.mxu0 %v228_v47 }
 0x1db   :  { %v371_v61 = vpop.f32.mrf.mxu0 }
 0x1dc   :  { %v372_v62 = vadd.f32 %v371_v61, %v250_v59 }
 0x1dd   :  { %v373_v63 = vpop.f32.mrf.mxu0 }
 0x1de   :  { %v378_v0 = vmul.f32 0.01, %v372_v62  ;;  %v374_v1 = vadd.f32 %v373_v63, %v254_v60 }
 0x1df   :  { %v375_v2 = vpop.f32.mrf.mxu0 }
 0x1e0   :  { %v379_v3 = vmul.f32 0.01, %v374_v1  ;;  %v380_v4 = vmax.f32 %v372_v62, %v378_v0 }
 0x1e1   :  { %v376_v5 = vpop.f32.mrf.mxu0 }
 0x1e2   :  { %v381_v6 = vmax.f32 %v374_v1, %v379_v3  ;;  %v382_v8 = vpack.c.bf16 %v380_v4, %v380_v4 }
 0x1e4   :  { %v383_v7 = vpack.c.bf16 %v381_v6, %v381_v6 }
 0x1e6   :  { %551 = vmatprep.mubr.bf16.mxu1 %v383_v7 }
 0x1e7   :  { %552 = vmatmul.mubr.bf16.vlgmr.msra.gmra.mxu1 %v382_v8 }
 0x2a7   :  { %v629_v9 = vpop.f32.mrf.mxu1 }
 0x2a9   :  { %v630_v11 = vpop.f32.mrf.mxu1 }
 0x2aa   :  { %v631_v12 = vadd.f32 %v630_v11, %v629_v9 }
 0x2ab   :  { %v632_v13 = vpop.f32.mrf.mxu1 }
 0x2ac   :  { %v554_v14 = vadd.f32 %v631_v12, %v592_v10 }
 0x2ad   :  { %v633_v15 = vpop.f32.mrf.mxu1 }
 0x2ae   :  { %v559_v16 = vmul.f32 0.01, %v554_v14 }
 0x2b0   :  { %v560_v17 = vmax.f32 %v554_v14, %v559_v16 }
 0x2b2   :  { %562 = vst.msk [vmem:[%s941_s9] sm:$0xff] %vm561_vm2, %v560_v17 }
 0x2b3   :  { %567 = vsyncpa [#allocation3], 1 }
 0x2b4   :  { %568 = vsyncpa [#allocation5], 1 }
 0x2b5   :  { %569 = vsyncpa [#allocation8], 1 }
 0x2b6   :  { %570 = vsyncpa [#allocation11], 1 }

</bundles_post_ra>
